<compile_context>
chip_gen: v7x
topology: tpu7x:2x2x1
jax: 0.10.0
libtpu: 0.0.40
codegen_flags: <defaults>
</compile_context>

<pallas_src>
import math
import functools

import jax
import jax.numpy as jnp
from jax.experimental import pallas as pl
from jax.experimental.pallas import tpu as pltpu


def _contrast_reg_kernel(a_ref, xcat_ref, w_ref, slab_ref, h_acc_ref,
                         *, tile_k, feat, xcat_resident):
    """One (node-tile, k-tile) step of the fused Contrast_Reg forward.

    a_ref    : (tile_n, tile_k) bf16  normalized adjacency block
    xcat_ref : (Nk, 2F) bf16 resident [X | Xc]   (or (tile_k, 2F) streamed)
    w_ref    : (2F, 2H) bf16  block-diagonal encoder weight (grid-invariant)
    slab_ref : (tile_n, 2H+F) f32   output slab  [ pos_z | neg_z | prop_z ]
    h_acc_ref: (tile_n, 2F)   f32   VMEM scratch accumulating A @ [X|Xc]
    """
    k = pl.program_id(1)

    @pl.when(k == 0)
    def _():
        h_acc_ref[...] = jnp.zeros_like(h_acc_ref)

    if xcat_resident:
        # xcat is fully VMEM-resident (DMA'd once); slice the contraction
        # chunk for this k-step.  Offset is a static multiple of tile_k.
        off = pl.multiple_of(k * tile_k, tile_k)
        xk = xcat_ref[pl.ds(off, tile_k), :]
    else:
        xk = xcat_ref[...]

    # Propagation: ONE bf16 MXU matmul over the concatenated features,
    # accumulated in f32 across the contraction (k) tiles.
    h_acc_ref[...] += jnp.dot(a_ref[...], xk,
                              preferred_element_type=jnp.float32)

    @pl.when(k == pl.num_programs(1) - 1)
    def _():
        h = h_acc_ref[...]                      # (tile_n, 2F) f32
        h_pos = h[:, :feat]                     # prop_z tile (= A @ X)
        # Block-diagonal encoder weight -> one matmul whose output is already
        # [pos_z | neg_z] along lanes (no row-stack concatenate / copy).
        z = jnp.maximum(
            jnp.dot(h.astype(jnp.bfloat16), w_ref[...],
                    preferred_element_type=jnp.float32),
            0.0)                                # (tile_n, 2H)
        # Single lane-dense unmasked (tile_n, 2H+F) store.
        slab_ref[...] = jnp.concatenate([z, h_pos], axis=-1)


def _round_up(v, m):
    return ((v + m - 1) // m) * m


def contrast_reg_forward(a_norm, x, x_corrupt, w_enc, *, tile_n=512, tile_k=1024):
    """Fused Contrast_Reg forward: returns ((pos_z, prop_z), neg_z, reg_vec)."""
    N, F = x.shape
    H = w_enc.shape[1]
    slab_w = 2 * H + F

    assert tile_n % 128 == 0 and tile_k % 128 == 0, "tiles must be 128-multiples"
    tile_n = min(tile_n, _round_up(N, 128))
    tile_k = min(tile_k, _round_up(N, 128))
    n_pad = _round_up(N, tile_n)          # padded node (row) extent
    k_pad = _round_up(N, tile_k)          # padded contraction (col) extent
    grid = (n_pad // tile_n, k_pad // tile_k)

    # bf16 the O(N^2) adjacency + features (halves HBM traffic, native bf16
    # MXU path); accumulation stays f32 inside the kernel.  Zero padding is
    # harmless: padded cols/rows contribute 0 to the matmuls.
    a_p = jnp.pad(a_norm, ((0, n_pad - N), (0, k_pad - N))).astype(jnp.bfloat16)
    xcat = jnp.concatenate([x, x_corrupt], axis=1)                  # (N, 2F)
    xcat_p = jnp.pad(xcat, ((0, k_pad - N), (0, 0))).astype(jnp.bfloat16)

    # Block-diagonal encoder weight: [A@X | A@Xc] @ W_blkdiag = [pos | neg].
    w_bd = jnp.zeros((2 * F, 2 * H), jnp.float32)
    w_bd = w_bd.at[:F, :H].set(w_enc).at[F:, H:].set(w_enc)
    w_bd = w_bd.astype(jnp.bfloat16)

    # Keep [X | Xc] fully VMEM-resident (one DMA) when it fits the budget;
    # otherwise stream (tile_k, 2F) blocks per k-step (large tile_n keeps the
    # refetch multiplier small).
    xcat_bytes = k_pad * 2 * F * 2
    xcat_resident = xcat_bytes <= (16 << 20)
    if xcat_resident:
        xcat_spec = pl.BlockSpec((k_pad, 2 * F), lambda i, k: (0, 0),
                                 pipeline_mode=pl.Buffered(1))
        xcat_vmem = xcat_bytes
    else:
        xcat_spec = pl.BlockSpec((tile_k, 2 * F), lambda i, k: (k, 0))
        xcat_vmem = 2 * tile_k * 2 * F * 2

    # Explicit VMEM budget for the chosen tiles (+ headroom), clamped to the
    # smallest physical VMEM across generations (v7x: 64 MiB per TensorCore).
    vmem_need = (2 * tile_n * tile_k * 2          # A, double-buffered, bf16
                 + xcat_vmem                      # [X | Xc]
                 + 2 * F * 2 * H * 2              # W block-diag, single buffer
                 + 2 * tile_n * slab_w * 4        # output slab, double-buffered
                 + tile_n * 2 * F * 4)            # f32 accumulator scratch
    vmem_limit = min(max(int(vmem_need * 1.25) + (4 << 20), 16 << 20), 64 << 20)

    cost = pl.CostEstimate(
        flops=2 * n_pad * k_pad * (2 * F) + 2 * n_pad * (2 * F) * (2 * H),
        transcendentals=0,
        bytes_accessed=(n_pad * k_pad * 2
                        + (xcat_bytes if xcat_resident
                           else grid[0] * k_pad * 2 * F * 2)
                        + 2 * F * 2 * H * 2
                        + n_pad * slab_w * 4),
    )

    kernel = functools.partial(_contrast_reg_kernel, tile_k=tile_k, feat=F,
                               xcat_resident=xcat_resident)

    slab = pl.pallas_call(
        kernel,
        out_shape=jax.ShapeDtypeStruct((n_pad, slab_w), jnp.float32),
        grid_spec=pltpu.PrefetchScalarGridSpec(
            num_scalar_prefetch=0,
            grid=grid,
            in_specs=[
                # adjacency block (i, k).  If traces still show an exposed
                # A-stream DMA at these tile sizes, add
                # pipeline_mode=pl.Buffered(3) here.
                pl.BlockSpec((tile_n, tile_k), lambda i, k: (i, k)),
                # [X | Xc]: resident (constant index_map) or streamed per k.
                xcat_spec,
                # block-diagonal encoder weight: grid-invariant -> 1 buffer.
                pl.BlockSpec((2 * F, 2 * H), lambda i, k: (0, 0),
                             pipeline_mode=pl.Buffered(1)),
            ],
            out_specs=pl.BlockSpec((tile_n, slab_w), lambda i, k: (i, 0)),
            scratch_shapes=[pltpu.VMEM((tile_n, 2 * F), jnp.float32)],
        ),
        compiler_params=pltpu.CompilerParams(
            # node tiles are independent -> "parallel" (2 TCs on v7x, though
            # the kernel is HBM-bound so aggregate gain is modest);
            # contraction axis carries the h accumulator -> "arbitrary".
            dimension_semantics=("parallel", "arbitrary"),
            vmem_limit_bytes=vmem_limit,
        ),
        cost_estimate=cost,
    )(a_p, xcat_p, w_bd)

    pos_z = slab[:N, :H]
    neg_z = slab[:N, H:2 * H]
    prop_z = slab[:N, 2 * H:]
    # reg_vec = sigmoid(mean(pos_z, 0)); done here (cheap O(N*H) reduction) so
    # the kernel has no cross-tile carry; divides by the TRUE N (robust to the
    # zero-padded rows, which were sliced off above anyway).
    reg_vec = jax.nn.sigmoid(jnp.sum(pos_z, axis=0) / jnp.float32(N))
    return (pos_z, prop_z), neg_z, reg_vec


# ----------------------------- glue (plain JAX) -----------------------------

def build_normalized_adjacency(key, n_nodes):
    """Dense D^{-1/2}(A + I)D^{-1/2} from a random symmetric edge set."""
    a = jax.random.bernoulli(key, p=0.05, shape=(n_nodes, n_nodes))
    a = jnp.logical_or(a, a.T).astype(jnp.float32)
    a = a + jnp.eye(n_nodes, dtype=jnp.float32)       # self loops
    a = jnp.minimum(a, 1.0)
    deg = jnp.sum(a, axis=1)
    d_inv_sqrt = 1.0 / jnp.sqrt(deg)
    return a * d_inv_sqrt[:, None] * d_inv_sqrt[None, :]


def uniform_init(key, shape, size):
    """torch_geometric `uniform(size, tensor)`: U(-1/sqrt(size), 1/sqrt(size))."""
    bound = 1.0 / math.sqrt(size)
    return jax.random.uniform(key, shape, jnp.float32, minval=-bound, maxval=bound)


def reference_forward(a_norm, x, x_corrupt, w_enc):
    """Pure-JAX reference with the same compute-dtype policy as the kernel
    (bf16 operands for both matmuls, f32 accumulation)."""
    a = a_norm.astype(jnp.bfloat16)
    h_pos = jnp.dot(a, x.astype(jnp.bfloat16), preferred_element_type=jnp.float32)
    h_neg = jnp.dot(a, x_corrupt.astype(jnp.bfloat16),
                    preferred_element_type=jnp.float32)
    w = w_enc.astype(jnp.bfloat16)
    pos_z = jnp.maximum(jnp.dot(h_pos.astype(jnp.bfloat16), w,
                                preferred_element_type=jnp.float32), 0.0)
    neg_z = jnp.maximum(jnp.dot(h_neg.astype(jnp.bfloat16), w,
                                preferred_element_type=jnp.float32), 0.0)
    prop_z = h_pos
    reg_vec = jax.nn.sigmoid(jnp.mean(pos_z, axis=0))
    return (pos_z, prop_z), neg_z, reg_vec


if __name__ == "__main__":
    key = jax.random.PRNGKey(0)
    k_adj, k_x, k_perm, k_wenc, k_wreg, k_wcon = jax.random.split(key, 6)

    # small synthetic graph: 256 nodes, 64 input features, hidden = 32
    N, F, HIDDEN = 256, 64, 32

    a_norm = build_normalized_adjacency(k_adj, N)
    x = jax.random.normal(k_x, (N, F), dtype=jnp.float32)

    # corruption: shuffle node features among nodes (fixed permutation)
    perm = jax.random.permutation(k_perm, N)
    x_corrupt = x[perm]

    # deterministic parameter init (shapes from module __init__ / encoder)
    w_enc = uniform_init(k_wenc, (F, HIDDEN), F)                    # encoder weight
    weight = uniform_init(k_wreg, (HIDDEN, HIDDEN), HIDDEN)         # self.weight (reg)
    contrast_weight = uniform_init(k_wcon, (HIDDEN, HIDDEN), HIDDEN)
    # NOTE: `weight` / `contrast_weight` are initialized (as in __init__) but
    # are not used in forward(); they feed discriminate()/loss() only.

    fwd = jax.jit(functools.partial(contrast_reg_forward,
                                    tile_n=512, tile_k=1024))
    (pos_z, prop_z), neg_z, reg_vec = fwd(a_norm, x, x_corrupt, w_enc)
    jax.block_until_ready((pos_z, prop_z, neg_z, reg_vec))

    # sanity check against a pure-JAX reference (same mixed-precision policy:
    # bf16 operands for both matmuls, f32 accumulation).
    (pos_r, prop_r), neg_r, reg_r = reference_forward(a_norm, x, x_corrupt, w_enc)
    assert jnp.allclose(pos_z, pos_r, atol=1e-2, rtol=1e-2)
    assert jnp.allclose(prop_z, prop_r, atol=1e-2, rtol=1e-2)
    assert jnp.allclose(neg_z, neg_r, atol=1e-2, rtol=1e-2)
    assert jnp.allclose(reg_vec, reg_r, atol=1e-2, rtol=1e-2)

    print("KERNEL_OK")
</pallas_src>

<mosaic_0001>
module attributes {stable_mosaic.version = 11 : i64} {
  func.func @_contrast_reg_kernel(%arg0: i32, %arg1: i32, %arg2: memref<256x256xbf16, #tpu.memory_space<vmem>>, %arg3: memref<256x128xbf16, #tpu.memory_space<vmem>>, %arg4: memref<128x64xbf16, #tpu.memory_space<vmem>>, %arg5: memref<256x128xf32, #tpu.memory_space<vmem>>, %arg6: memref<256x128xf32, #tpu.memory_space<vmem>>) attributes {dimension_semantics = [#tpu.dimension_semantics<parallel>, #tpu.dimension_semantics<arbitrary>], iteration_bounds = array<i64: 1, 1>, scalar_prefetch = 0 : i64, scratch_operands = 1 : i64, tpu.core_type = #tpu.core_type<tc>, window_params = [{transform_indices = @transform_0, window_bounds = array<i64: 256, 256>}, {pipeline_mode = #tpu.pipeline_mode<synchronous>, transform_indices = @transform_1, window_bounds = array<i64: 256, 128>}, {pipeline_mode = #tpu.pipeline_mode<synchronous>, transform_indices = @transform_2, window_bounds = array<i64: 128, 64>}, {transform_indices = @transform_3, window_bounds = array<i64: 256, 128>}]} {
    %c0_i32 = arith.constant 0 : i32
    %0 = arith.cmpi eq, %arg1, %c0_i32 : i32
    %1 = arith.extui %0 : i1 to i32
    %c0_i32_0 = arith.constant 0 : i32
    %2 = arith.cmpi ne, %1, %c0_i32_0 : i32
    scf.if %2 {
      %cst_9 = arith.constant 0.000000e+00 : f32
      %15 = vector.broadcast %cst_9 : f32 to vector<256x128xf32>
      %c0_10 = arith.constant 0 : index
      %c0_11 = arith.constant 0 : index
      %16 = vector.load %arg6[%c0_10, %c0_11] : memref<256x128xf32, #tpu.memory_space<vmem>>, vector<256x128xf32>
      tpu.vector_store %arg6[%c0_10, %c0_11], %15 {strides = array<i32>} : memref<256x128xf32, #tpu.memory_space<vmem>>, vector<256x128xf32>,
    } else {
    }
    %c256_i32 = arith.constant 256 : i32
    %3 = arith.muli %arg1, %c256_i32 : i32
    %4 = tpu.assume_multiple %3, 256 : i32
    %5 = arith.index_cast %4 : i32 to index
    %c0 = arith.constant 0 : index
    %6 = vector.load %arg3[%5, %c0] : memref<256x128xbf16, #tpu.memory_space<vmem>>, vector<256x128xbf16>
    %c0_1 = arith.constant 0 : index
    %c0_2 = arith.constant 0 : index
    %7 = vector.load %arg6[%c0_1, %c0_2] : memref<256x128xf32, #tpu.memory_space<vmem>>, vector<256x128xf32>
    %c0_3 = arith.constant 0 : index
    %c0_4 = arith.constant 0 : index
    %8 = vector.load %arg2[%c0_3, %c0_4] : memref<256x256xbf16, #tpu.memory_space<vmem>>, vector<256x256xbf16>
    %cst = arith.constant dense<0.000000e+00> : vector<256x128xf32>
    %9 = tpu.matmul %8, %6, %cst {dimension_numbers = #tpu.dot_dimension_numbers<[1], [0], [0], [1], [0, 0, 1, 1], [], []>} : vector<256x256xbf16>, vector<256x128xbf16>, vector<256x128xf32> -> vector<256x128xf32>
    %10 = arith.addf %7, %9 : vector<256x128xf32>
    %c0_5 = arith.constant 0 : index
    %c0_6 = arith.constant 0 : index
    %11 = vector.load %arg6[%c0_5, %c0_6] : memref<256x128xf32, #tpu.memory_space<vmem>>, vector<256x128xf32>
    tpu.vector_store %arg6[%c0_5, %c0_6], %10 {strides = array<i32>} : memref<256x128xf32, #tpu.memory_space<vmem>>, vector<256x128xf32>,
    %c0_i32_7 = arith.constant 0 : i32
    %12 = arith.cmpi eq, %arg1, %c0_i32_7 : i32
    %13 = arith.extui %12 : i1 to i32
    %c0_i32_8 = arith.constant 0 : i32
    %14 = arith.cmpi ne, %13, %c0_i32_8 : i32
    scf.if %14 {
      %c0_9 = arith.constant 0 : index
      %c0_10 = arith.constant 0 : index
      %15 = vector.load %arg6[%c0_9, %c0_10] : memref<256x128xf32, #tpu.memory_space<vmem>>, vector<256x128xf32>
      %16 = vector.extract_strided_slice %15 {offsets = [0, 0], sizes = [256, 64], strides = [1, 1]} : vector<256x128xf32> to vector<256x64xf32>
      %17 = arith.truncf %15 : vector<256x128xf32> to vector<256x128xbf16>
      %c0_11 = arith.constant 0 : index
      %c0_12 = arith.constant 0 : index
      %18 = vector.load %arg4[%c0_11, %c0_12] : memref<128x64xbf16, #tpu.memory_space<vmem>>, vector<128x64xbf16>
      %cst_13 = arith.constant dense<0.000000e+00> : vector<256x64xf32>
      %19 = tpu.matmul %17, %18, %cst_13 {dimension_numbers = #tpu.dot_dimension_numbers<[1], [0], [0], [1], [0, 0, 1, 1], [], []>} : vector<256x128xbf16>, vector<128x64xbf16>, vector<256x64xf32> -> vector<256x64xf32>
      %cst_14 = arith.constant 0.000000e+00 : f32
      %20 = vector.broadcast %cst_14 : f32 to vector<256x64xf32>
      %21 = arith.maximumf %19, %20 : vector<256x64xf32>
      %22 = tpu.concatenate %21, %16 in 1 : vector<256x64xf32>, vector<256x64xf32> -> vector<256x128xf32>
      %c0_15 = arith.constant 0 : index
      %c0_16 = arith.constant 0 : index
      %23 = vector.load %arg5[%c0_15, %c0_16] : memref<256x128xf32, #tpu.memory_space<vmem>>, vector<256x128xf32>
      tpu.vector_store %arg5[%c0_15, %c0_16], %22 {strides = array<i32>} : memref<256x128xf32, #tpu.memory_space<vmem>>, vector<256x128xf32>,
    } else {
    }
    return
  }
  func.func @transform_0(%arg0: i32, %arg1: i32) -> (i32, i32) {
    %c0_i32 = arith.constant 0 : i32
    return %arg0, %arg1 : i32, i32
  }
  func.func @transform_1(%arg0: i32, %arg1: i32) -> (i32, i32) {
    %c0_i32 = arith.constant 0 : i32
    %c0_i32_0 = arith.constant 0 : i32
    %c0_i32_1 = arith.constant 0 : i32
    return %c0_i32, %c0_i32_0 : i32, i32
  }
  func.func @transform_2(%arg0: i32, %arg1: i32) -> (i32, i32) {
    %c0_i32 = arith.constant 0 : i32
    %c0_i32_0 = arith.constant 0 : i32
    %c0_i32_1 = arith.constant 0 : i32
    return %c0_i32, %c0_i32_0 : i32, i32
  }
  func.func @transform_3(%arg0: i32, %arg1: i32) -> (i32, i32) {
    %c0_i32 = arith.constant 0 : i32
    %c0_i32_0 = arith.constant 0 : i32
    return %arg0, %c0_i32 : i32, i32
  }
}

</mosaic_0001>

<bundles_post_ra>
// kernel: contrast_reg_forward.1
= control target key start
LH: loop header
LB: loop body
LE: loop exit
PB: predicated region body
PF: predicated region fallthrough
CT: control target
= control target key end

     0   :  { %vm1069_vm0 = vcmask 523264   ;;  %s1880_s1 = inlined_call_operand.vmem [shape: bf16[256,128], index: 1, kind: input, shape index: {}]   ;;  %s1881_s0 = inlined_call_operand.vmem [shape: bf16[256,256], index: 0, kind: input, shape index: {}]   ;;  %s1882_s2 = inlined_call_operand.vmem [shape: bf16[128,64], index: 2, kind: input, shape index: {}]   ;;  %s1883_s3 = inlined_call_operand.vmem [shape: f32[256,128], index: 3, kind: output, shape index: {}]  }
   0x1   :  { %v1397_v0 = vld [vmem:[%s1880_s1 + $0x40] sm:$0xff]   ;;  %v1399_v2 = vld [vmem:[%s1880_s1 + $0x48] sm:$0xff]   ;;  %v1401_v4 = vld [vmem:[%s1880_s1 + $0x50] sm:$0xff]  }
   0x2   :  { %v1398_v1 = vld [vmem:[%s1880_s1] sm:$0xff]   ;;  %1196 = vmatprep.subr.bf16.mxu0 %v1397_v0  ;;  %1380 = vmatprep.subr.bf16.mxu1 %v1397_v0  ;;  %v1400_v3 = vld [vmem:[%s1880_s1 + $0x8] sm:$0xff]   ;;  %v1402_v5 = vld [vmem:[%s1880_s1 + $0x10] sm:$0xff]  }
   0x3   :  { %1197 = vmatpush3.bf16.msra.mxu0 %v1398_v1  ;;  %1388 = vmatpush3.bf16.msra.mxu1 %v1398_v1  ;;  %v1403_v6 = vld [vmem:[%s1880_s1 + $0x58] sm:$0xff]   ;;  %v1405_v8 = vld [vmem:[%s1880_s1 + $0x60] sm:$0xff]   ;;  %v1407_v10 = vld [vmem:[%s1880_s1 + $0x68] sm:$0xff]  }
   0x4   :  { %1198 = vmatprep.subr.bf16.mxu0 %v1399_v2  ;;  %1381 = vmatprep.subr.bf16.mxu1 %v1399_v2  ;;  %v1404_v7 = vld [vmem:[%s1880_s1 + $0x18] sm:$0xff]   ;;  %v1406_v9 = vld [vmem:[%s1880_s1 + $0x20] sm:$0xff]   ;;  %v1408_v13 = vld [vmem:[%s1880_s1 + $0x28] sm:$0xff]  }
   0x5   :  { %v1415_v11 = vld [vmem:[%s1881_s0 + $0x4] ss:$8 sps:$4 sm:$0xff]   ;;  %v1409_v14 = vld [vmem:[%s1880_s1 + $0x70] sm:$0xff]   ;;  %v1411_v16 = vld [vmem:[%s1880_s1 + $0x78] sm:$0xff]  }
   0x6   :  { %v1418_v12 = vld [vmem:[%s1881_s0 + $0xc4] ss:$8 sps:$4 sm:$0xff]   ;;  %440 = vmatprep.mubr.bf16.mxu0 %v1415_v11  ;;  %v1410_v15 = vld [vmem:[%s1880_s1 + $0x30] sm:$0xff]   ;;  %v1412_v17 = vld [vmem:[%s1880_s1 + $0x38] sm:$0xff]  }
   0x7   :  { %1199 = vmatpush3.bf16.msra.mxu0 %v1400_v3  ;;  %1389 = vmatpush3.bf16.msra.mxu1 %v1400_v3  ;;  %v1413_v18 = vld [vmem:[%s1881_s0] ss:$8 sps:$4 sm:$0xff]   ;;  %v1419_v20 = vld [vmem:[%s1881_s0 + $0x14] ss:$8 sps:$4 sm:$0xff]   ;;  %v1421_v22 = vld [vmem:[%s1881_s0 + $0x10] ss:$8 sps:$4 sm:$0xff]  }
   0x8   :  { %1200 = vmatprep.subr.bf16.mxu0 %v1401_v4  ;;  %1382 = vmatprep.subr.bf16.mxu1 %v1401_v4  ;;  %v1416_v19 = vld [vmem:[%s1881_s0 + $0xc0] ss:$8 sps:$4 sm:$0xff]   ;;  %v1422_v21 = vld [vmem:[%s1881_s0 + $0xd4] ss:$8 sps:$4 sm:$0xff]   ;;  %v1424_v23 = vld [vmem:[%s1881_s0 + $0xd0] ss:$8 sps:$4 sm:$0xff]  }
   0x9   :  { %536 = vmatprep.mubr.bf16.mxu1 %v1418_v12  ;;  %v1425_v24 = vld [vmem:[%s1881_s0 + $0x24] ss:$8 sps:$4 sm:$0xff]   ;;  %v1463_v28 = vld [vmem:[%s1882_s2 + $0x10] sm:$0xff]   ;;  %v1427_v29 = vld [vmem:[%s1881_s0 + $0x20] ss:$8 sps:$4 sm:$0xff]  }
   0xa   :  { %v1461_v25 = vld [vmem:[%s1882_s2] sm:$0xff]   ;;  %v1462_v27 = vld [vmem:[%s1882_s2 + $0x8] sm:$0xff]   ;;  %v1431_v31 = vld [vmem:[%s1881_s0 + $0x34] ss:$8 sps:$4 sm:$0xff]  }
   0xb   :  { %1201 = vmatpush3.bf16.msra.mxu0 %v1402_v5  ;;  %1390 = vmatpush3.bf16.msra.mxu1 %v1402_v5  ;;  %v1428_v26 = vld [vmem:[%s1881_s0 + $0xe4] ss:$8 sps:$4 sm:$0xff]   ;;  %v1430_v30 = vld [vmem:[%s1881_s0 + $0xe0] ss:$8 sps:$4 sm:$0xff]   ;;  %v1458_v32 = vld [vmem:[%s1881_s0 + $0xf4] ss:$8 sps:$4 sm:$0xff]  }
   0xc   :  { %1202 = vmatprep.subr.bf16.mxu0 %v1403_v6  ;;  %1383 = vmatprep.subr.bf16.mxu1 %v1403_v6  ;;  %v1464_v33 = vld [vmem:[%s1882_s2 + $0x18] sm:$0xff]   ;;  %v1434_v36 = vld [vmem:[%s1881_s0 + $0x44] ss:$8 sps:$4 sm:$0xff]   ;;  %v1436_v37 = vld [vmem:[%s1881_s0 + $0x40] ss:$8 sps:$4 sm:$0xff]  }
   0xd   :  { %v1433_v34 = vld [vmem:[%s1881_s0 + $0x30] ss:$8 sps:$4 sm:$0xff]   ;;  %v1437_v38 = vld [vmem:[%s1881_s0 + $0x54] ss:$8 sps:$4 sm:$0xff]   ;;  %v1440_v40 = vld [vmem:[%s1881_s0 + $0x64] ss:$8 sps:$4 sm:$0xff]  }
   0xe   :  { %v1460_v35 = vld [vmem:[%s1881_s0 + $0xf0] ss:$8 sps:$4 sm:$0xff]   ;;  %v1442_v41 = vld [vmem:[%s1881_s0 + $0x60] ss:$8 sps:$4 sm:$0xff]   ;;  %v1443_v42 = vld [vmem:[%s1881_s0 + $0x74] ss:$8 sps:$4 sm:$0xff]  }
   0xf   :  { %1203 = vmatpush3.bf16.msra.mxu0 %v1404_v7  ;;  %1391 = vmatpush3.bf16.msra.mxu1 %v1404_v7  ;;  %v1439_v39 = vld [vmem:[%s1881_s0 + $0x50] ss:$8 sps:$4 sm:$0xff]   ;;  %v1446_v44 = vld [vmem:[%s1881_s0 + $0x84] ss:$8 sps:$4 sm:$0xff]   ;;  %v1448_v45 = vld [vmem:[%s1881_s0 + $0x80] ss:$8 sps:$4 sm:$0xff]  }
  0x10   :  { %1204 = vmatprep.subr.bf16.mxu0 %v1405_v8  ;;  %1384 = vmatprep.subr.bf16.mxu1 %v1405_v8  ;;  %v1445_v43 = vld [vmem:[%s1881_s0 + $0x70] ss:$8 sps:$4 sm:$0xff]   ;;  %v1449_v46 = vld [vmem:[%s1881_s0 + $0x94] ss:$8 sps:$4 sm:$0xff]   ;;  %v1452_v48 = vld [vmem:[%s1881_s0 + $0xa4] ss:$8 sps:$4 sm:$0xff]  }
  0x11   :  { %v1451_v47 = vld [vmem:[%s1881_s0 + $0x90] ss:$8 sps:$4 sm:$0xff]   ;;  %v1454_v49 = vld [vmem:[%s1881_s0 + $0xa0] ss:$8 sps:$4 sm:$0xff]   ;;  %v1455_v50 = vld [vmem:[%s1881_s0 + $0xb4] ss:$8 sps:$4 sm:$0xff]  }
  0x12   :  { %v1465_v51 = vld [vmem:[%s1882_s2 + $0x20] sm:$0xff]   ;;  %v1457_v52 = vld [vmem:[%s1881_s0 + $0xb0] ss:$8 sps:$4 sm:$0xff]   ;;  %v1466_v53 = vld [vmem:[%s1882_s2 + $0x28] sm:$0xff]   ;;  %s1469_s0 = smov 64  }
  0x13   :  { %1205 = vmatpush3.bf16.msra.mxu0 %v1406_v9  ;;  %1392 = vmatpush3.bf16.msra.mxu1 %v1406_v9  ;;  %v1467_v54 = vld [vmem:[%s1882_s2 + $0x30] sm:$0xff]   ;;  %v1468_v55 = vld [vmem:[%s1882_s2 + $0x38] sm:$0xff]  }
  0x14   :  { %1206 = vmatprep.subr.bf16.mxu0 %v1407_v10  ;;  %1385 = vmatprep.subr.bf16.mxu1 %v1407_v10 }
  0x17   :  { %1207 = vmatpush3.bf16.msra.mxu0 %v1408_v13  ;;  %1393 = vmatpush3.bf16.msra.mxu1 %v1408_v13 }
  0x18   :  { %1208 = vmatprep.subr.bf16.mxu0 %v1409_v14  ;;  %1386 = vmatprep.subr.bf16.mxu1 %v1409_v14 }
  0x1b   :  { %1209 = vmatpush3.bf16.msra.mxu0 %v1410_v15  ;;  %1394 = vmatpush3.bf16.msra.mxu1 %v1410_v15 }
  0x1c   :  { %1210 = vmatprep.subr.bf16.mxu0 %v1411_v16  ;;  %1387 = vmatprep.subr.bf16.mxu1 %v1411_v16 }
  0x1f   :  { %1211 = vmatpush3.bf16.msra.mxu0 %v1412_v17  ;;  %1395 = vmatpush3.bf16.msra.mxu1 %v1412_v17 }
  0x20   :  { %1332 = vmatprep.subr.bf16.mxu1 %v1461_v25 }
  0x22   :  { %441 = vmatmul.mubr.bf16.vlgmr.msra.gmra.mrb[0].mxu0 %v1413_v18  ;;  %537 = vmatmul.mubr.bf16.vlgmr.msra.gmra.mrb[0].mxu1 %v1416_v19 }
  0x23   :  { %448 = vmatprep.mubr.bf16.mxu0 %v1419_v20  ;;  %544 = vmatprep.mubr.bf16.mxu1 %v1422_v21 }
  0x24   :  { %1333 = vmatpush3.bf16.msra.mxu1 %v1461_v25 }
  0x25   :  { %1334 = vmatprep.subr.bf16.mxu1 %v1462_v27 }
  0x28   :  { %1335 = vmatpush3.bf16.msra.mxu1 %v1462_v27 }
  0x29   :  { %1336 = vmatprep.subr.bf16.mxu1 %v1463_v28 }
  0x2a   :  { %449 = vmatmul.mubr.bf16.gmra.mrb[4].mxu0 %v1421_v22  ;;  %545 = vmatmul.mubr.bf16.gmra.mrb[4].mxu1 %v1424_v23 }
  0x2b   :  { %456 = vmatprep.mubr.bf16.mxu0 %v1425_v24  ;;  %552 = vmatprep.mubr.bf16.mxu1 %v1428_v26 }
  0x2c   :  { %1337 = vmatpush3.bf16.msra.mxu1 %v1463_v28 }
  0x2d   :  { %1338 = vmatprep.subr.bf16.mxu1 %v1464_v33 }
  0x30   :  { %1339 = vmatpush3.bf16.msra.mxu1 %v1464_v33 }
  0x31   :  { %1340 = vmatprep.subr.bf16.mxu1 %v1465_v51 }
  0x32   :  { %457 = vmatmul.mubr.bf16.gmra.mrb[8].mxu0 %v1427_v29  ;;  %553 = vmatmul.mubr.bf16.gmra.mrb[8].mxu1 %v1430_v30 }
  0x33   :  { %464 = vmatprep.mubr.bf16.mxu0 %v1431_v31  ;;  %560 = vmatprep.mubr.bf16.mxu1 %v1458_v32 }
  0x34   :  { %1341 = vmatpush3.bf16.msra.mxu1 %v1465_v51 }
  0x35   :  { %1342 = vmatprep.subr.bf16.mxu1 %v1466_v53 }
  0x38   :  { %1343 = vmatpush3.bf16.msra.mxu1 %v1466_v53 }
  0x39   :  { %1344 = vmatprep.subr.bf16.mxu1 %v1467_v54 }
  0x3a   :  { %465 = vmatmul.mubr.bf16.gmra.mrb[12].mxu0 %v1433_v34  ;;  %561 = vmatmul.mubr.bf16.gmra.mrb[12].mxu1 %v1460_v35 }
  0x3b   :  { %472 = vmatprep.mubr.bf16.mxu0 %v1434_v36 }
  0x3c   :  { %1345 = vmatpush3.bf16.msra.mxu1 %v1467_v54 }
  0x3d   :  { %1346 = vmatprep.subr.bf16.mxu1 %v1468_v55 }
  0x40   :  { %1347 = vmatpush3.bf16.msra.mxu1 %v1468_v55 }
  0x42   :  { %473 = vmatmul.mubr.bf16.gmra.mrb[16].mxu0 %v1436_v37 }
  0x43   :  { %480 = vmatprep.mubr.bf16.mxu0 %v1437_v38 }
  0x4a   :  { %481 = vmatmul.mubr.bf16.gmra.mrb[20].mxu0 %v1439_v39 }
  0x4b   :  { %488 = vmatprep.mubr.bf16.mxu0 %v1440_v40 }
  0x52   :  { %489 = vmatmul.mubr.bf16.gmra.mrb[24].mxu0 %v1442_v41 }
  0x53   :  { %496 = vmatprep.mubr.bf16.mxu0 %v1443_v42 }
  0x5a   :  { %497 = vmatmul.mubr.bf16.gmra.mrb[28].mxu0 %v1445_v43 }
  0x5b   :  { %504 = vmatprep.mubr.bf16.mxu0 %v1446_v44 }
  0x62   :  { %505 = vmatmul.mubr.bf16.gmra.mrb[32].mxu0 %v1448_v45 }
  0x63   :  { %512 = vmatprep.mubr.bf16.mxu0 %v1449_v46 }
  0x6a   :  { %513 = vmatmul.mubr.bf16.gmra.mrb[36].mxu0 %v1451_v47 }
  0x6b   :  { %520 = vmatprep.mubr.bf16.mxu0 %v1452_v48 }
  0x72   :  { %521 = vmatmul.mubr.bf16.gmra.mrb[40].mxu0 %v1454_v49 }
  0x73   :  { %528 = vmatprep.mubr.bf16.mxu0 %v1455_v50 }
  0x7a   :  { %529 = vmatmul.mubr.bf16.gmra.mrb[44].mxu0 %v1457_v52 }
  0xf5   :  { %v1212_v56 = vpop.f32.mrb[0].mxu0  ;;  %v1284_v57 = vpop.f32.mrb[0].mxu1 }
  0xf6   :  { %v1213_v58 = vpop.f32.mrb[1].mxu0  ;;  %v1285_v59 = vpop.f32.mrb[1].mxu1 }
  0xf7   :  { %v1214_v60 = vadd.f32 %v1213_v58, %v1212_v56  ;;  %v1215_v61 = vpop.f32.mrb[2].mxu0  ;;  %v1658_v62 = vadd.f32 %v1285_v59, %v1284_v57  ;;  %v1287_v63 = vpop.f32.mrb[2].mxu1 }
  0xf8   :  { %v1216_v0 = vpop.f32.mrb[3].mxu0  ;;  %v1288_v1 = vpop.f32.mrb[3].mxu1 }
  0xf9   :  { %v1217_v2 = vadd.f32 %v1216_v0, %v1215_v61  ;;  %973 = vrot.lane.b32.xlu0 %v1214_v60, %s1469_s0  ;;  %v1661_v3 = vadd.f32 %v1288_v1, %v1287_v63 }
  0xfb   :  { %v668_v4 = vpack.c.bf16 %v1217_v2, %v1214_v60  ;;  %v680_v5 = vpack.c.bf16 %v1661_v3, %v1658_v62  ;;  %1023 = vrot.lane.b32.xlu1 %v1661_v3, %s1469_s0 }
  0xfd   :  { %v1218_v6 = vpop.f32.mrb[4].mxu0  ;;  %1021 = vrot.lane.b32.xlu0 %v1658_v62, %s1469_s0  ;;  %1348 = vmatprep.mubr.bf16.mxu1 %v668_v4  ;;  %v1290_v7 = vpop.f32.mrb[4].mxu1 }
  0xfe   :  { %v1219_v8 = vpop.f32.mrb[5].mxu0  ;;  %v1291_v9 = vpop.f32.mrb[5].mxu1 }
  0xff   :  { %v1220_v10 = vadd.f32 %v1219_v8, %v1218_v6  ;;  %v1221_v11 = vpop.f32.mrb[6].mxu0  ;;  %v1669_v12 = vadd.f32 %v1291_v9, %v1290_v7  ;;  %v1293_v13 = vpop.f32.mrb[6].mxu1 }
 0x100   :  { %v1222_v14 = vpop.f32.mrb[7].mxu0  ;;  %v1294_v15 = vpop.f32.mrb[7].mxu1 }
 0x101   :  { %v1223_v16 = vadd.f32 %v1222_v14, %v1221_v11  ;;  %977 = vrot.lane.b32.xlu1 %v1220_v10, %s1469_s0  ;;  %975 = vrot.lane.b32.xlu0 %v1217_v2, %s1469_s0  ;;  %v1673_v17 = vadd.f32 %v1294_v15, %v1293_v13 }
 0x103   :  { %v669_v18 = vpack.c.bf16 %v1223_v16, %v1220_v10  ;;  %v681_v19 = vpack.c.bf16 %v1673_v17, %v1669_v12 }
 0x105   :  { %v1224_v20 = vpop.f32.mrb[8].mxu0  ;;  %979 = vrot.lane.b32.xlu1 %v1223_v16, %s1469_s0  ;;  %1025 = vrot.lane.b32.xlu0 %v1669_v12, %s1469_s0  ;;  %v1296_v21 = vpop.f32.mrb[8].mxu1 }
 0x106   :  { %1349 = vmatmul.mubr.bf16.vlgmr.msra.gmra.mrb[16].mxu1 %v669_v18  ;;  %v1225_v22 = vpop.f32.mrb[9].mxu0  ;;  %v1297_v23 = vpop.f32.mrb[9].mxu1 }
 0x107   :  { %v1226_v24 = vadd.f32 %v1225_v22, %v1224_v20  ;;  %v1227_v25 = vpop.f32.mrb[10].mxu0  ;;  %v1680_v26 = vadd.f32 %v1297_v23, %v1296_v21  ;;  %v1299_v27 = vpop.f32.mrb[10].mxu1 }
 0x108   :  { %v1228_v28 = vpop.f32.mrb[11].mxu0  ;;  %v1300_v29 = vpop.f32.mrb[11].mxu1 }
 0x109   :  { %v1229_v30 = vadd.f32 %v1228_v28, %v1227_v25  ;;  %1027 = vrot.lane.b32.xlu1 %v1673_v17, %s1469_s0  ;;  %981 = vrot.lane.b32.xlu0 %v1226_v24, %s1469_s0  ;;  %v1685_v31 = vadd.f32 %v1300_v29, %v1299_v27 }
 0x10b   :  { %v670_v32 = vpack.c.bf16 %v1229_v30, %v1226_v24  ;;  %v682_v33 = vpack.c.bf16 %v1685_v31, %v1680_v26 }
 0x10d   :  { %v1230_v34 = vpop.f32.mrb[12].mxu0  ;;  %983 = vrot.lane.b32.xlu1 %v1229_v30, %s1469_s0  ;;  %1029 = vrot.lane.b32.xlu0 %v1680_v26, %s1469_s0  ;;  %v1302_v35 = vpop.f32.mrb[12].mxu1 }
 0x10e   :  { %1352 = vmatprep.mubr.bf16.mxu1 %v670_v32  ;;  %v1231_v36 = vpop.f32.mrb[13].mxu0  ;;  %v1303_v37 = vpop.f32.mrb[13].mxu1 }
 0x10f   :  { %v1232_v38 = vadd.f32 %v1231_v36, %v1230_v34  ;;  %v1233_v39 = vpop.f32.mrb[14].mxu0  ;;  %v1692_v40 = vadd.f32 %v1303_v37, %v1302_v35  ;;  %v1305_v41 = vpop.f32.mrb[14].mxu1 }
 0x110   :  { %v1234_v42 = vpop.f32.mrb[15].mxu0  ;;  %v1306_v43 = vpop.f32.mrb[15].mxu1 }
 0x111   :  { %v1235_v44 = vadd.f32 %v1234_v42, %v1233_v39  ;;  %1031 = vrot.lane.b32.xlu1 %v1685_v31, %s1469_s0  ;;  %985 = vrot.lane.b32.xlu0 %v1232_v38, %s1469_s0  ;;  %v1697_v45 = vadd.f32 %v1306_v43, %v1305_v41 }
 0x113   :  { %v671_v46 = vpack.c.bf16 %v1235_v44, %v1232_v38  ;;  %v683_v47 = vpack.c.bf16 %v1697_v45, %v1692_v40 }
 0x115   :  { %v1236_v48 = vpop.f32.mrb[16].mxu0  ;;  %987 = vrot.lane.b32.xlu1 %v1235_v44, %s1469_s0  ;;  %1353 = vmatmul.mubr.bf16.gmra.mrb[20].mxu1 %v671_v46 }
 0x116   :  { %v1237_v49 = vpop.f32.mrb[17].mxu0 }
 0x117   :  { %v1238_v50 = vadd.f32 %v1237_v49, %v1236_v48  ;;  %v1239_v51 = vpop.f32.mrb[18].mxu0 }
 0x118   :  { %v1240_v52 = vpop.f32.mrb[19].mxu0 }
 0x119   :  { %v1241_v53 = vadd.f32 %v1240_v52, %v1239_v51  ;;  %989 = vrot.lane.b32.xlu0 %v1238_v50, %s1469_s0 }
 0x11b   :  { %v672_v54 = vpack.c.bf16 %v1241_v53, %v1238_v50  ;;  %991 = vrot.lane.b32.xlu1 %v1241_v53, %s1469_s0 }
 0x11d   :  { %v1242_v55 = vpop.f32.mrb[20].mxu0  ;;  %1356 = vmatprep.mubr.bf16.mxu1 %v672_v54 }
 0x11e   :  { %v1243_v56 = vpop.f32.mrb[21].mxu0 }
 0x11f   :  { %v1244_v57 = vadd.f32 %v1243_v56, %v1242_v55  ;;  %v1245_v58 = vpop.f32.mrb[22].mxu0 }
 0x120   :  { %v1246_v59 = vpop.f32.mrb[23].mxu0 }
 0x121   :  { %v1247_v60 = vadd.f32 %v1246_v59, %v1245_v58  ;;  %993 = vrot.lane.b32.xlu0 %v1244_v57, %s1469_s0 }
 0x123   :  { %v673_v61 = vpack.c.bf16 %v1247_v60, %v1244_v57  ;;  %995 = vrot.lane.b32.xlu1 %v1247_v60, %s1469_s0 }
 0x125   :  { %v1248_v63 = vpop.f32.mrb[24].mxu0  ;;  %1357 = vmatmul.mubr.bf16.gmra.mrb[24].mxu1 %v673_v61 }
 0x126   :  { %v1249_v0 = vpop.f32.mrb[25].mxu0 }
 0x127   :  { %v1250_v1 = vadd.f32 %v1249_v0, %v1248_v63  ;;  %v1251_v2 = vpop.f32.mrb[26].mxu0 }
 0x128   :  { %v1252_v4 = vpop.f32.mrb[27].mxu0 }
 0x129   :  { %v1253_v6 = vadd.f32 %v1252_v4, %v1251_v2  ;;  %997 = vrot.lane.b32.xlu0 %v1250_v1, %s1469_s0 }
 0x12b   :  { %v674_v7 = vpack.c.bf16 %v1253_v6, %v1250_v1  ;;  %999 = vrot.lane.b32.xlu1 %v1253_v6, %s1469_s0 }
 0x12d   :  { %v1254_v8 = vpop.f32.mrb[28].mxu0  ;;  %1360 = vmatprep.mubr.bf16.mxu1 %v674_v7 }
 0x12e   :  { %v1255_v9 = vpop.f32.mrb[29].mxu0 }
 0x12f   :  { %v1256_v10 = vadd.f32 %v1255_v9, %v1254_v8  ;;  %v1257_v11 = vpop.f32.mrb[30].mxu0 }
 0x130   :  { %v1258_v13 = vpop.f32.mrb[31].mxu0 }
 0x131   :  { %v1259_v14 = vadd.f32 %v1258_v13, %v1257_v11  ;;  %1001 = vrot.lane.b32.xlu0 %v1256_v10, %s1469_s0 }
 0x133   :  { %v675_v15 = vpack.c.bf16 %v1259_v14, %v1256_v10  ;;  %1003 = vrot.lane.b32.xlu1 %v1259_v14, %s1469_s0 }
 0x135   :  { %v1260_v16 = vpop.f32.mrb[32].mxu0  ;;  %1361 = vmatmul.mubr.bf16.gmra.mrb[28].mxu1 %v675_v15 }
 0x136   :  { %v1261_v18 = vpop.f32.mrb[33].mxu0 }
 0x137   :  { %v1262_v20 = vadd.f32 %v1261_v18, %v1260_v16  ;;  %v1263_v21 = vpop.f32.mrb[34].mxu0 }
 0x138   :  { %v1264_v22 = vpop.f32.mrb[35].mxu0 }
 0x139   :  { %v1265_v23 = vadd.f32 %v1264_v22, %v1263_v21  ;;  %1005 = vrot.lane.b32.xlu0 %v1262_v20, %s1469_s0 }
 0x13b   :  { %v676_v24 = vpack.c.bf16 %v1265_v23, %v1262_v20  ;;  %1007 = vrot.lane.b32.xlu1 %v1265_v23, %s1469_s0 }
 0x13d   :  { %v1266_v25 = vpop.f32.mrb[36].mxu0  ;;  %1364 = vmatprep.mubr.bf16.mxu1 %v676_v24 }
 0x13e   :  { %v1267_v27 = vpop.f32.mrb[37].mxu0 }
 0x13f   :  { %v1268_v28 = vadd.f32 %v1267_v27, %v1266_v25  ;;  %v1269_v29 = vpop.f32.mrb[38].mxu0 }
 0x140   :  { %v1270_v30 = vpop.f32.mrb[39].mxu0 }
 0x141   :  { %v1271_v32 = vadd.f32 %v1270_v30, %v1269_v29  ;;  %1009 = vrot.lane.b32.xlu0 %v1268_v28, %s1469_s0 }
 0x143   :  { %v677_v34 = vpack.c.bf16 %v1271_v32, %v1268_v28  ;;  %1011 = vrot.lane.b32.xlu1 %v1271_v32, %s1469_s0 }
 0x145   :  { %v1272_v35 = vpop.f32.mrb[40].mxu0  ;;  %1365 = vmatmul.mubr.bf16.gmra.mrb[32].mxu1 %v677_v34 }
 0x146   :  { %v1273_v36 = vpop.f32.mrb[41].mxu0 }
 0x147   :  { %v1274_v37 = vadd.f32 %v1273_v36, %v1272_v35  ;;  %v1275_v38 = vpop.f32.mrb[42].mxu0 }
 0x148   :  { %v1276_v39 = vpop.f32.mrb[43].mxu0 }
 0x149   :  { %v1277_v41 = vadd.f32 %v1276_v39, %v1275_v38  ;;  %1013 = vrot.lane.b32.xlu0 %v1274_v37, %s1469_s0 }
 0x14b   :  { %v678_v42 = vpack.c.bf16 %v1277_v41, %v1274_v37  ;;  %1015 = vrot.lane.b32.xlu1 %v1277_v41, %s1469_s0 }
 0x14d   :  { %v1278_v43 = vpop.f32.mrb[44].mxu0  ;;  %1368 = vmatprep.mubr.bf16.mxu1 %v678_v42 }
 0x14e   :  { %v1279_v44 = vpop.f32.mrb[45].mxu0 }
 0x14f   :  { %v1280_v46 = vadd.f32 %v1279_v44, %v1278_v43  ;;  %v1281_v48 = vpop.f32.mrb[46].mxu0 }
 0x150   :  { %v1282_v49 = vpop.f32.mrb[47].mxu0 }
 0x151   :  { %v1283_v50 = vadd.f32 %v1282_v49, %v1281_v48  ;;  %1017 = vrot.lane.b32.xlu0 %v1280_v46, %s1469_s0 }
 0x153   :  { %v679_v51 = vpack.c.bf16 %v1283_v50, %v1280_v46  ;;  %1019 = vrot.lane.b32.xlu1 %v1283_v50, %s1469_s0 }
 0x155   :  { %1369 = vmatmul.mubr.bf16.gmra.mrb[36].mxu1 %v679_v51  ;;  %1033 = vrot.lane.b32.xlu0 %v1692_v40, %s1469_s0 }
 0x156   :  { %1372 = vmatprep.mubr.bf16.mxu1 %v680_v5 }
 0x157   :  { %1035 = vrot.lane.b32.xlu1 %v1697_v45, %s1469_s0 }
 0x15d   :  { %1373 = vmatmul.mubr.bf16.gmra.mrb[40].mxu1 %v681_v19 }
 0x15e   :  { %1376 = vmatprep.mubr.bf16.mxu1 %v682_v33 }
 0x165   :  { %1377 = vmatmul.mubr.bf16.gmra.mrb[44].mxu1 %v683_v47 }
 0x16b   :  { %v974_v52 = vpop.permute.xlu0 %973 }
 0x16d   :  { %v1734_v53 = vpop.permute.xlu1 %1023 }
 0x16f   :  { %v1736_v62 = vpop.permute.xlu0 %1021 }
 0x173   :  { %v978_v3 = vpop.permute.xlu1 %977  ;;  %v976_v5 = vpop.permute.xlu0 %975 }
 0x177   :  { %v980_v54 = vpop.permute.xlu1 %979  ;;  %v1738_v55 = vpop.permute.xlu0 %1025 }
 0x17b   :  { %v1740_v17 = vpop.permute.xlu1 %1027  ;;  %v982_v58 = vpop.permute.xlu0 %981 }
 0x17f   :  { %v984_v61 = vpop.permute.xlu1 %983  ;;  %v1758_v63 = vpop.permute.xlu0 %1029 }
 0x183   :  { %v1760_v0 = vpop.permute.xlu1 %1031  ;;  %v986_v6 = vpop.permute.xlu0 %985 }
 0x187   :  { %v988_v13 = vpop.permute.xlu1 %987 }
 0x18b   :  { %v990_v20 = vpop.permute.xlu0 %989 }
 0x18d   :  { %v992_v21 = vpop.permute.xlu1 %991 }
 0x193   :  { %v994_v25 = vpop.permute.xlu0 %993 }
 0x195   :  { %v996_v34 = vpop.permute.xlu1 %995 }
 0x19b   :  { %v998_v39 = vpop.permute.xlu0 %997 }
 0x19d   :  { %v1000_v41 = vpop.permute.xlu1 %999 }
 0x1a3   :  { %v1002_v46 = vpop.permute.xlu0 %1001 }
 0x1d9   :  { %v1350_v12 = vpop.f32.mrb[16].mxu1 }
 0x1da   :  { %v911_v19 = vmax.f32 %v1350_v12, 0.0  ;;  %v782_v26 = vpop.f32.mrb[17].mxu1 }
 0x1db   :  { %v909_v31 = vmax.f32 %v782_v26, 0.0  ;;  %v1351_v33 = vpop.f32.mrb[18].mxu1  ;;  %v1006_v26 = vpop.permute.xlu0 %1005 }
 0x1dc   :  { %v1072_v40 = vsel %vm1069_vm0, %v911_v19, %v978_v3  ;;  %v912_v45 = vmax.f32 %v1351_v33, 0.0  ;;  %v785_v47 = vpop.f32.mrb[19].mxu1  ;;  %v1004_v3 = vpop.permute.xlu1 %1003 }
 0x1dd   :  { %1104 = vst [vmem:[%s1883_s3 + $0x10] sm:$0xff] %v1072_v40  ;;  %v1070_v56 = vsel %vm1069_vm0, %v909_v31, %v974_v52  ;;  %v910_v57 = vmax.f32 %v785_v47, 0.0 }
 0x1de   :  { %1102 = vst [vmem:[%s1883_s3] sm:$0xff] %v1070_v56  ;;  %v1073_v59 = vsel %vm1069_vm0, %v912_v45, %v980_v54 }
 0x1df   :  { %1105 = vst [vmem:[%s1883_s3 + $0x18] sm:$0xff] %v1073_v59  ;;  %v1071_v60 = vsel %vm1069_vm0, %v910_v57, %v976_v5  ;;  %v1010_v47 = vpop.permute.xlu0 %1009 }
 0x1e0   :  { %1103 = vst [vmem:[%s1883_s3 + $0x8] sm:$0xff] %v1071_v60  ;;  %v1008_v31 = vpop.permute.xlu1 %1007 }
 0x1e8   :  { %v1354_v1 = vpop.f32.mrb[20].mxu1 }
 0x1e9   :  { %v915_v2 = vmax.f32 %v1354_v1, 0.0  ;;  %v798_v4 = vpop.f32.mrb[21].mxu1 }
 0x1ea   :  { %v913_v7 = vmax.f32 %v798_v4, 0.0  ;;  %v1355_v8 = vpop.f32.mrb[22].mxu1 }
 0x1eb   :  { %v1076_v9 = vsel %vm1069_vm0, %v915_v2, %v986_v6  ;;  %v916_v10 = vmax.f32 %v1355_v8, 0.0  ;;  %v801_v11 = vpop.f32.mrb[23].mxu1 }
 0x1ec   :  { %1108 = vst [vmem:[%s1883_s3 + $0x30] sm:$0xff] %v1076_v9  ;;  %v1074_v14 = vsel %vm1069_vm0, %v913_v7, %v982_v58  ;;  %v914_v15 = vmax.f32 %v801_v11, 0.0  ;;  %v1014_v7 = vpop.permute.xlu0 %1013 }
 0x1ed   :  { %1106 = vst [vmem:[%s1883_s3 + $0x20] sm:$0xff] %v1074_v14  ;;  %v1077_v16 = vsel %vm1069_vm0, %v916_v10, %v988_v13 }
 0x1ee   :  { %1109 = vst [vmem:[%s1883_s3 + $0x38] sm:$0xff] %v1077_v16  ;;  %v1075_v18 = vsel %vm1069_vm0, %v914_v15, %v984_v61  ;;  %v1012_v61 = vpop.permute.xlu1 %1011 }
 0x1ef   :  { %1107 = vst [vmem:[%s1883_s3 + $0x28] sm:$0xff] %v1075_v18 }
 0x1f0   :  { %v1018_v13 = vpop.permute.xlu0 %1017 }
 0x1f2   :  { %v1016_v8 = vpop.permute.xlu1 %1015 }
 0x1f8   :  { %v1358_v22 = vpop.f32.mrb[24].mxu1 }
 0x1f9   :  { %v919_v23 = vmax.f32 %v1358_v22, 0.0  ;;  %v814_v24 = vpop.f32.mrb[25].mxu1 }
 0x1fa   :  { %v917_v27 = vmax.f32 %v814_v24, 0.0  ;;  %v1359_v28 = vpop.f32.mrb[26].mxu1 }
 0x1fb   :  { %v1080_v29 = vsel %vm1069_vm0, %v919_v23, %v994_v25  ;;  %v920_v30 = vmax.f32 %v1359_v28, 0.0  ;;  %v817_v32 = vpop.f32.mrb[27].mxu1 }
 0x1fc   :  { %1112 = vst [vmem:[%s1883_s3 + $0x50] sm:$0xff] %v1080_v29  ;;  %v1078_v35 = vsel %vm1069_vm0, %v917_v27, %v990_v20  ;;  %v918_v36 = vmax.f32 %v817_v32, 0.0 }
 0x1fd   :  { %1110 = vst [vmem:[%s1883_s3 + $0x40] sm:$0xff] %v1078_v35  ;;  %v1081_v37 = vsel %vm1069_vm0, %v920_v30, %v996_v34 }
 0x1fe   :  { %1113 = vst [vmem:[%s1883_s3 + $0x58] sm:$0xff] %v1081_v37  ;;  %v1079_v38 = vsel %vm1069_vm0, %v918_v36, %v992_v21  ;;  %v1020_v21 = vpop.permute.xlu1 %1019 }
 0x1ff   :  { %1111 = vst [vmem:[%s1883_s3 + $0x48] sm:$0xff] %v1079_v38 }
 0x208   :  { %v1362_v42 = vpop.f32.mrb[28].mxu1 }
 0x209   :  { %v923_v43 = vmax.f32 %v1362_v42, 0.0  ;;  %v830_v44 = vpop.f32.mrb[29].mxu1 }
 0x20a   :  { %v921_v48 = vmax.f32 %v830_v44, 0.0  ;;  %v1363_v49 = vpop.f32.mrb[30].mxu1 }
 0x20b   :  { %v1084_v50 = vsel %vm1069_vm0, %v923_v43, %v1002_v46  ;;  %v924_v51 = vmax.f32 %v1363_v49, 0.0  ;;  %v833_v52 = vpop.f32.mrb[31].mxu1  ;;  %v1034_v43 = vpop.permute.xlu0 %1033 }
 0x20c   :  { %1116 = vst [vmem:[%s1883_s3 + $0x70] sm:$0xff] %v1084_v50  ;;  %v1082_v5 = vsel %vm1069_vm0, %v921_v48, %v998_v39  ;;  %v922_v54 = vmax.f32 %v833_v52, 0.0  ;;  %v1036_v50 = vpop.permute.xlu1 %1035 }
 0x20d   :  { %1114 = vst [vmem:[%s1883_s3 + $0x60] sm:$0xff] %v1082_v5  ;;  %v1085_v12 = vsel %vm1069_vm0, %v924_v51, %v1004_v3 }
 0x20e   :  { %1117 = vst [vmem:[%s1883_s3 + $0x78] sm:$0xff] %v1085_v12  ;;  %v1083_v19 = vsel %vm1069_vm0, %v922_v54, %v1000_v41 }
 0x20f   :  { %1115 = vst [vmem:[%s1883_s3 + $0x68] sm:$0xff] %v1083_v19 }
 0x218   :  { %v1366_v33 = vpop.f32.mrb[32].mxu1 }
 0x219   :  { %v927_v40 = vmax.f32 %v1366_v33, 0.0  ;;  %v846_v45 = vpop.f32.mrb[33].mxu1 }
 0x21a   :  { %v925_v56 = vmax.f32 %v846_v45, 0.0  ;;  %v1367_v57 = vpop.f32.mrb[34].mxu1 }
 0x21b   :  { %v1088_v58 = vsel %vm1069_vm0, %v927_v40, %v1010_v47  ;;  %v928_v59 = vmax.f32 %v1367_v57, 0.0  ;;  %v849_v60 = vpop.f32.mrb[35].mxu1 }
 0x21c   :  { %1120 = vst [vmem:[%s1883_s3 + $0x90] sm:$0xff] %v1088_v58  ;;  %v1086_v1 = vsel %vm1069_vm0, %v925_v56, %v1006_v26  ;;  %v926_v2 = vmax.f32 %v849_v60, 0.0 }
 0x21d   :  { %1118 = vst [vmem:[%s1883_s3 + $0x80] sm:$0xff] %v1086_v1  ;;  %v1089_v4 = vsel %vm1069_vm0, %v928_v59, %v1012_v61 }
 0x21e   :  { %1121 = vst [vmem:[%s1883_s3 + $0x98] sm:$0xff] %v1089_v4  ;;  %v1087_v6 = vsel %vm1069_vm0, %v926_v2, %v1008_v31 }
 0x21f   :  { %1119 = vst [vmem:[%s1883_s3 + $0x88] sm:$0xff] %v1087_v6 }
 0x228   :  { %v1370_v9 = vpop.f32.mrb[36].mxu1 }
 0x229   :  { %v931_v10 = vmax.f32 %v1370_v9, 0.0  ;;  %v862_v11 = vpop.f32.mrb[37].mxu1 }
 0x22a   :  { %v929_v14 = vmax.f32 %v862_v11, 0.0  ;;  %v1371_v15 = vpop.f32.mrb[38].mxu1 }
 0x22b   :  { %v1092_v16 = vsel %vm1069_vm0, %v931_v10, %v1018_v13  ;;  %v932_v18 = vmax.f32 %v1371_v15, 0.0  ;;  %v865_v20 = vpop.f32.mrb[39].mxu1 }
 0x22c   :  { %1124 = vst [vmem:[%s1883_s3 + $0xb0] sm:$0xff] %v1092_v16  ;;  %v1090_v22 = vsel %vm1069_vm0, %v929_v14, %v1014_v7  ;;  %v930_v23 = vmax.f32 %v865_v20, 0.0 }
 0x22d   :  { %1122 = vst [vmem:[%s1883_s3 + $0xa0] sm:$0xff] %v1090_v22  ;;  %v1093_v24 = vsel %vm1069_vm0, %v932_v18, %v1020_v21 }
 0x22e   :  { %1125 = vst [vmem:[%s1883_s3 + $0xb8] sm:$0xff] %v1093_v24  ;;  %v1091_v25 = vsel %vm1069_vm0, %v930_v23, %v1016_v8 }
 0x22f   :  { %1123 = vst [vmem:[%s1883_s3 + $0xa8] sm:$0xff] %v1091_v25 }
 0x230   :  { %v1374_v27 = vpop.f32.mrb[40].mxu1 }
 0x231   :  { %v935_v28 = vmax.f32 %v1374_v27, 0.0  ;;  %v878_v29 = vpop.f32.mrb[41].mxu1 }
 0x232   :  { %v933_v30 = vmax.f32 %v878_v29, 0.0  ;;  %v1375_v32 = vpop.f32.mrb[42].mxu1 }
 0x233   :  { %v1096_v34 = vsel %vm1069_vm0, %v935_v28, %v1738_v55  ;;  %v936_v35 = vmax.f32 %v1375_v32, 0.0  ;;  %v881_v36 = vpop.f32.mrb[43].mxu1 }
 0x234   :  { %1128 = vst [vmem:[%s1883_s3 + $0xd0] sm:$0xff] %v1096_v34  ;;  %v1094_v37 = vsel %vm1069_vm0, %v933_v30, %v1736_v62  ;;  %v934_v38 = vmax.f32 %v881_v36, 0.0 }
 0x235   :  { %1126 = vst [vmem:[%s1883_s3 + $0xc0] sm:$0xff] %v1094_v37  ;;  %v1097_v39 = vsel %vm1069_vm0, %v936_v35, %v1740_v17 }
 0x236   :  { %1129 = vst [vmem:[%s1883_s3 + $0xd8] sm:$0xff] %v1097_v39  ;;  %v1095_v55 = vsel %vm1069_vm0, %v934_v38, %v1734_v53 }
 0x237   :  { %1127 = vst [vmem:[%s1883_s3 + $0xc8] sm:$0xff] %v1095_v55 }
 0x238   :  { %v1378_v62 = vpop.f32.mrb[44].mxu1 }
 0x239   :  { %v939_v41 = vmax.f32 %v1378_v62, 0.0  ;;  %v894_v42 = vpop.f32.mrb[45].mxu1 }
 0x23a   :  { %v937_v44 = vmax.f32 %v894_v42, 0.0  ;;  %v1379_v46 = vpop.f32.mrb[46].mxu1 }
 0x23b   :  { %v1100_v48 = vsel %vm1069_vm0, %v939_v41, %v1034_v43  ;;  %v940_v17 = vmax.f32 %v1379_v46, 0.0  ;;  %v897_v49 = vpop.f32.mrb[47].mxu1 }
 0x23c   :  { %1132 = vst [vmem:[%s1883_s3 + $0xf0] sm:$0xff] %v1100_v48  ;;  %v1098_v53 = vsel %vm1069_vm0, %v937_v44, %v1758_v63  ;;  %v938_v51 = vmax.f32 %v897_v49, 0.0 }
 0x23d   :  { %1130 = vst [vmem:[%s1883_s3 + $0xe0] sm:$0xff] %v1098_v53  ;;  %v1101_v52 = vsel %vm1069_vm0, %v940_v17, %v1036_v50 }
 0x23e   :  { %1133 = vst [vmem:[%s1883_s3 + $0xf8] sm:$0xff] %v1101_v52  ;;  %v1099_v3 = vsel %vm1069_vm0, %v938_v51, %v1760_v0 }
 0x23f   :  { %1131 = vst [vmem:[%s1883_s3 + $0xe8] sm:$0xff] %v1099_v3 }

</bundles_post_ra>
